<compile_context>
chip_gen: v7x
topology: tpu7x:2x2x1
jax: 0.10.0
libtpu: 0.0.40
codegen_flags: <defaults>
</compile_context>

<pallas_src>
import math
import functools

import jax
import jax.numpy as jnp
from jax.experimental import pallas as pl
from jax.experimental.pallas import tpu as pltpu


def _round_up(x, m):
    return ((x + m - 1) // m) * m


def _lora_kernel(x_ref, a_ref, b_ref, o_ref, h_ref, *, compute_dtype):
    # First (larger) matmul + the x cast happen once per row-tile, not per
    # output tile: hoisted under j == 0 into the persistent h scratch.
    @pl.when(pl.program_id(1) == 0)
    def _():
        x = x_ref[...].astype(compute_dtype)
        h_ref[...] = jnp.dot(x, a_ref[...], preferred_element_type=jnp.float32)

    # Per output tile: only the tiny rank-r second matmul + fused store cast.
    y = jnp.dot(h_ref[...].astype(b_ref.dtype), b_ref[...],
                preferred_element_type=jnp.float32)
    o_ref[...] = y.astype(o_ref.dtype)


def _vmem_budgets():
    """Generation-aware (block_budget, vmem_limit) in bytes."""
    try:
        cap = pltpu.get_tpu_info().vmem_capacity_bytes
    except Exception:  # interpreter / unknown part: assume the small (v7x) VMEM
        cap = 64 * 1024 * 1024
    if cap >= 100 * 1024 * 1024:
        # v5e / v6e: 128 MiB physical VMEM -> use most of it.
        return 72 * 1024 * 1024, 96 * 1024 * 1024
    # v7x: 64 MiB per TensorCore -> stay conservative.
    return 24 * 1024 * 1024, 40 * 1024 * 1024


def lora_forward(x, a_t, b_t, scaling, *, tile_n=512, tile_out=512):
    """Eval-mode LoRA forward.

    x   : [..., in_features], any float dtype (returned dtype matches x).
    a_t : [in_features, r]   lora_A weight, pre-transposed (compute dtype).
    b_t : [r, out_features]  lora_B weight, pre-transposed (compute dtype).
    """
    previous_dtype = x.dtype
    compute_dtype = a_t.dtype

    batch_shape = x.shape[:-1]
    in_features = x.shape[-1]
    r = a_t.shape[-1]
    out_features = b_t.shape[-1]

    # Fold scaling into the tiny A_T once (O(in*r)).
    a_scaled = (a_t * jnp.asarray(scaling, dtype=compute_dtype)).astype(compute_dtype)

    x2d = x.reshape(-1, in_features)     # no dtype pass in the wrapper
    n = x2d.shape[0]

    x_bytes = jnp.dtype(previous_dtype).itemsize
    w_bytes = jnp.dtype(compute_dtype).itemsize
    o_bytes = jnp.dtype(previous_dtype).itemsize

    block_budget, vmem_limit = _vmem_budgets()

    # Output tile: full dim when narrow, otherwise a lane-dense multiple of
    # 128 (ragged edge handled by pl.cdiv + Pallas masking).
    t_out = _round_up(max(tile_out, 128), 128)
    if out_features <= t_out:
        t_out = out_features

    # N tile granularity: sublane packing (16 covers bf16; multiple of 8 for f32).
    sub = 16 if jnp.dtype(compute_dtype).itemsize < 4 else 8
    n_pad = _round_up(max(n, 1), sub)

    def _footprint(tn, tout):
        # Double-buffered x/out blocks + (double-buffered) weight tiles +
        # lane-padded h scratch.
        return (2 * tn * in_features * x_bytes
                + 2 * tn * tout * o_bytes
                + 2 * in_features * r * w_bytes
                + 2 * r * tout * w_bytes
                + tn * max(r, 128) * 4)

    # Start at the requested tile, grow toward the budget (amortize the
    # ~0.35 us/grid-step overhead), then shrink only if we still overflow.
    t_n = max(sub, min(_round_up(tile_n, sub), n_pad))
    cap = min(1024, n_pad)
    while t_n * 2 <= cap and _footprint(t_n * 2, t_out) <= block_budget:
        t_n *= 2
    while t_n > sub and _footprint(t_n, t_out) > block_budget:
        t_n = max(sub, _round_up(t_n // 2, sub))
    while (t_out != out_features and t_out > 128
           and _footprint(t_n, t_out) > block_budget):
        t_out = max(128, _round_up(t_out // 2, 128))

    grid = (pl.cdiv(n, t_n), pl.cdiv(out_features, t_out))

    kernel = functools.partial(_lora_kernel, compute_dtype=compute_dtype)

    cost = pl.CostEstimate(
        flops=2 * n * r * (in_features + out_features),
        transcendentals=0,
        bytes_accessed=(n * in_features * x_bytes
                        + n * out_features * o_bytes
                        + in_features * r * w_bytes
                        + r * out_features * w_bytes),
    )

    out = pl.pallas_call(
        kernel,
        out_shape=jax.ShapeDtypeStruct((n, out_features), previous_dtype),
        grid_spec=pltpu.PrefetchScalarGridSpec(
            num_scalar_prefetch=0,
            grid=grid,
            in_specs=[
                pl.BlockSpec((t_n, in_features), lambda i, j: (i, 0)),
                pl.BlockSpec((in_features, r), lambda i, j: (0, 0)),
                pl.BlockSpec((r, t_out), lambda i, j: (0, j)),
            ],
            out_specs=pl.BlockSpec((t_n, t_out), lambda i, j: (i, j)),
            scratch_shapes=[pltpu.VMEM((t_n, r), jnp.float32)],
        ),
        compiler_params=pltpu.CompilerParams(
            # j must be sequential ("arbitrary") so the h scratch hoist is
            # valid and a v7x megacore split lands on i (x read once per core).
            dimension_semantics=("parallel", "arbitrary"),
            vmem_limit_bytes=vmem_limit,
        ),
        cost_estimate=cost,
    )(x2d, a_scaled, b_t)

    return out.reshape(*batch_shape, out_features)


def init_lora_params(key, in_features, out_features, r, dtype=jnp.float32):
    """Deterministic init matching the PyTorch module:
       lora_A: kaiming_uniform_(a=sqrt(5)) on weight of shape (r, in_features)
       lora_B: zeros on weight of shape (out_features, r).
    Returned pre-transposed: A_T [in, r], B_T [r, out]."""
    # kaiming uniform with a=sqrt(5): bound = 1/sqrt(fan_in), fan_in = in_features.
    bound = 1.0 / math.sqrt(in_features)
    a_weight = jax.random.uniform(
        key, (r, in_features), dtype=dtype, minval=-bound, maxval=bound
    )
    b_weight = jnp.zeros((out_features, r), dtype=dtype)
    return a_weight.T, b_weight.T


if __name__ == "__main__":
    # lora_config: lora_r=8, lora_alpha=16, lora_dropout=0.0 (eval mode)
    in_features = 32
    out_features = 32
    lora_r = 8
    lora_alpha = 16
    scaling = lora_alpha / lora_r          # = 2.0 (exact power of two)

    batch, seq = 2, 8

    key = jax.random.PRNGKey(0)
    k_x, k_a, k_b = jax.random.split(key, 3)

    x = jax.random.normal(k_x, (batch, seq, in_features), dtype=jnp.float32)

    # Faithful PyTorch-style init (zeros B) is provided by init_lora_params;
    # for a non-trivial numeric check we replace B with small random values.
    a_t, b_t = init_lora_params(k_a, in_features, out_features, lora_r)
    b_t = 0.02 * jax.random.normal(k_b, b_t.shape, dtype=b_t.dtype)

    y = lora_forward(x, a_t, b_t, scaling)
    y = jax.block_until_ready(y)

    # Reference in plain JAX at highest matmul precision. The kernel's MXU f32
    # matmuls may use a bf16-pass decomposition, so the tolerance is sized for
    # that (values here are O(0.1), worst-case abs error ~1e-3).
    x2d = x.reshape(-1, in_features)
    ref = jnp.matmul(
        jnp.matmul(x2d, a_t, precision="highest"), b_t, precision="highest"
    ) * scaling
    ref = ref.reshape(batch, seq, out_features)

    assert y.shape == (batch, seq, out_features)
    assert y.dtype == x.dtype
    assert jnp.allclose(y, ref, atol=2e-3, rtol=2e-2), float(
        jnp.max(jnp.abs(y - ref))
    )

    print("KERNEL_OK")
</pallas_src>

<mosaic_0001>
module attributes {stable_mosaic.version = 11 : i64} {
  func.func @_lora_kernel(%arg0: i32, %arg1: i32, %arg2: memref<16x32xf32, #tpu.memory_space<vmem>>, %arg3: memref<32x8xf32, #tpu.memory_space<vmem>>, %arg4: memref<8x32xf32, #tpu.memory_space<vmem>>, %arg5: memref<16x32xf32, #tpu.memory_space<vmem>>, %arg6: memref<16x8xf32, #tpu.memory_space<vmem>>) attributes {dimension_semantics = [#tpu.dimension_semantics<parallel>, #tpu.dimension_semantics<arbitrary>], iteration_bounds = array<i64: 1, 1>, scalar_prefetch = 0 : i64, scratch_operands = 1 : i64, tpu.core_type = #tpu.core_type<tc>, window_params = [{transform_indices = @transform_0, window_bounds = array<i64: 16, 32>}, {pipeline_mode = #tpu.pipeline_mode<synchronous>, transform_indices = @transform_1, window_bounds = array<i64: 32, 8>}, {transform_indices = @transform_2, window_bounds = array<i64: 8, 32>}, {transform_indices = @transform_3, window_bounds = array<i64: 16, 32>}]} {
    %c0_i32 = arith.constant 0 : i32
    %0 = arith.cmpi eq, %arg1, %c0_i32 : i32
    %1 = arith.extui %0 : i1 to i32
    %c0_i32_0 = arith.constant 0 : i32
    %2 = arith.cmpi ne, %1, %c0_i32_0 : i32
    scf.if %2 {
      %c0_6 = arith.constant 0 : index
      %c0_7 = arith.constant 0 : index
      %7 = vector.load %arg2[%c0_6, %c0_7] : memref<16x32xf32, #tpu.memory_space<vmem>>, vector<16x32xf32>
      %c0_8 = arith.constant 0 : index
      %c0_9 = arith.constant 0 : index
      %8 = vector.load %arg3[%c0_8, %c0_9] : memref<32x8xf32, #tpu.memory_space<vmem>>, vector<32x8xf32>
      %cst_10 = arith.constant dense<0.000000e+00> : vector<16x8xf32>
      %9 = tpu.matmul %7, %8, %cst_10 {dimension_numbers = #tpu.dot_dimension_numbers<[1], [0], [0], [1], [0, 0, 1, 1], [], []>} : vector<16x32xf32>, vector<32x8xf32>, vector<16x8xf32> -> vector<16x8xf32>
      %c0_11 = arith.constant 0 : index
      %c0_12 = arith.constant 0 : index
      %10 = vector.load %arg6[%c0_11, %c0_12] : memref<16x8xf32, #tpu.memory_space<vmem>>, vector<16x8xf32>
      tpu.vector_store %arg6[%c0_11, %c0_12], %9 {strides = array<i32>} : memref<16x8xf32, #tpu.memory_space<vmem>>, vector<16x8xf32>,
    } else {
    }
    %c0 = arith.constant 0 : index
    %c0_1 = arith.constant 0 : index
    %3 = vector.load %arg6[%c0, %c0_1] : memref<16x8xf32, #tpu.memory_space<vmem>>, vector<16x8xf32>
    %c0_2 = arith.constant 0 : index
    %c0_3 = arith.constant 0 : index
    %4 = vector.load %arg4[%c0_2, %c0_3] : memref<8x32xf32, #tpu.memory_space<vmem>>, vector<8x32xf32>
    %cst = arith.constant dense<0.000000e+00> : vector<16x32xf32>
    %5 = tpu.matmul %3, %4, %cst {dimension_numbers = #tpu.dot_dimension_numbers<[1], [0], [0], [1], [0, 0, 1, 1], [], []>} : vector<16x8xf32>, vector<8x32xf32>, vector<16x32xf32> -> vector<16x32xf32>
    %c0_4 = arith.constant 0 : index
    %c0_5 = arith.constant 0 : index
    %6 = vector.load %arg5[%c0_4, %c0_5] : memref<16x32xf32, #tpu.memory_space<vmem>>, vector<16x32xf32>
    tpu.vector_store %arg5[%c0_4, %c0_5], %5 {strides = array<i32>} : memref<16x32xf32, #tpu.memory_space<vmem>>, vector<16x32xf32>,
    return
  }
  func.func @transform_0(%arg0: i32, %arg1: i32) -> (i32, i32) {
    %c0_i32 = arith.constant 0 : i32
    %c0_i32_0 = arith.constant 0 : i32
    return %arg0, %c0_i32 : i32, i32
  }
  func.func @transform_1(%arg0: i32, %arg1: i32) -> (i32, i32) {
    %c0_i32 = arith.constant 0 : i32
    %c0_i32_0 = arith.constant 0 : i32
    %c0_i32_1 = arith.constant 0 : i32
    return %c0_i32, %c0_i32_0 : i32, i32
  }
  func.func @transform_2(%arg0: i32, %arg1: i32) -> (i32, i32) {
    %c0_i32 = arith.constant 0 : i32
    %c0_i32_0 = arith.constant 0 : i32
    return %c0_i32, %arg1 : i32, i32
  }
  func.func @transform_3(%arg0: i32, %arg1: i32) -> (i32, i32) {
    %c0_i32 = arith.constant 0 : i32
    return %arg0, %arg1 : i32, i32
  }
}

</mosaic_0001>

<bundles_post_ra>
// kernel: tpu_custom_call.1
= control target key start
LH: loop header
LB: loop body
LE: loop exit
PB: predicated region body
PF: predicated region fallthrough
CT: control target
= control target key end

     0   :  { %vm25_vm0 = vcmask 261120   ;;  %s338_s0 = inlined_call_operand.vmem [shape: f32[16,32], index: 0, kind: input, shape index: {}]   ;;  %s339_s1 = inlined_call_operand.vmem [shape: f32[32,8], index: 1, kind: input, shape index: {}]   ;;  %s340_s2 = inlined_call_operand.vmem [shape: f32[8,32], index: 2, kind: input, shape index: {}]   ;;  %s341_s3 = inlined_call_operand.hbm [shape: f32[16,32], index: 3, kind: output, shape index: {}]  }
   0x1   :  { %v21_v0 = vld [vmem:[%s339_s1] sm:$0xff]  ;;  %v22_v1 = vld [vmem:[%s339_s1 + $0x8] sm:$0xff]  ;;  %v23_v2 = vld [vmem:[%s339_s1 + $0x10] sm:$0xff] }
   0x2   :  { %v243_v3 = vpack.c.bf16 %v22_v1, %v21_v0  ;;  %v24_v4 = vld [vmem:[%s339_s1 + $0x18] sm:$0xff]  ;;  %v19_v5 = vld [vmem:[%s338_s0] sm:$0xff] }
   0x3   :  { %v247_v6 = vpack.c.bf16 %v24_v4, %v23_v2  ;;  %235 = vmatprep.mubr.msk.f32.mxu0 %vm25_vm0, %v19_v5 }
   0x4   :  { %8 = vsyncpa [#allocation4], 0  ;;  %244 = vmatprep.subr.bf16.mxu0 %v243_v3  ;;  %v20_v7 = vld [vmem:[%s338_s0 + $0x8] sm:$0xff]  ;;  %v112_v8 = vld [vmem:[%s340_s2] sm:$0xff]  ;;  %vm107_vm1 = vcmask 64512   ;;  %s278_s25 = smov [#allocation3]  }
   0x5   :  { %246 = vmatpush3.bf16.msra.mxu0 %v243_v3  ;;  %238 = vmatprep.subr.mxu1 %v112_v8  ;;  %s203_s26 = sshll.u32 %s278_s25, 4  ;;  %s204_s26 = int_to_ptr.vmem [resolvable:$true] %s203_s26 }
   0x6   :  { %248 = vmatprep.subr.bf16.mxu0 %v247_v6  ;;  %239 = vmatpush3.msra.mxu1 %v112_v8  ;;  %s254_s0 = scalar_lea.vmem %s204_s26, 256  ;;  %p259_p1 = scmp.lt.s32.totalorder %s204_s26, %s204_s26 }
   0x7   :  { %p255_p0 = scmp.ne.s32.totalorder %s204_s26, %s254_s0  ;;  %p260_p2 = scmp.lt.s32.totalorder %s254_s0, %s254_s0 }
   0x9   :  { %250 = vmatpush3.bf16.msra.mxu0 %v247_v6  ;;  %p261_p3 = por %p260_p2, %p259_p1 }
   0xb   :  { %p262_p4 = pnand %p261_p3, %p255_p0 }
   0xc   :  { %236 = vmatmul.mubr.msk.f32.vlgmr.msra.gmra.mrb[0].mxu0 %vm25_vm0, %v20_v7 }
  0xdf   :  { %v237_v9 = vpop.f32.mrb[0].mxu0 }
  0xe0   :  { %109 = vst.msk [vmem:[#allocation2 + $0x8] sm:$0xff] %vm107_vm1, %v237_v9  ;;  %v98_v10 = vpop.f32.mrb[1].mxu0 }
  0xe1   :  { %108 = vst.msk [vmem:[#allocation2] sm:$0xff] %vm107_vm1, %v98_v10 }
  0xe7   :  { %v111_v12 = vld [vmem:[#allocation2 + $0x8] sm:$0xff] }
  0xe8   :  { %v110_v11 = vld [vmem:[#allocation2] sm:$0xff] }
  0xe9   :  { %240 = vmatprep.mubr.msk.f32.mxu1 %vm107_vm1, %v110_v11 }
  0xea   :  { %241 = vmatmul.mubr.msk.f32.vlgmr.msra.gmra.mrb[0].mxu1 %vm107_vm1, %v111_v12 }
 0x1bd   :  { %v242_v13 = vpop.f32.mrb[0].mxu1 }
 0x1be   :  { %197 = vst.msk [vmem:[#allocation3 + $0x8] sm:$0xff] %vm25_vm0, %v242_v13  ;;  %v186_v14 = vpop.f32.mrb[1].mxu1 }
 0x1bf   :  { %196 = vst.msk [vmem:[#allocation3] sm:$0xff] %vm25_vm0, %v186_v14 }
 0x1c0   :  { %265 = shalt.err (!%p262_p4)
}
 0x1c1   :  { %s266_s28 = scalar_lea.hbm %s341_s3, 256 }
 0x1c2   :  { %p267_p5 = scmp.ne.s32.totalorder %s341_s3, %s266_s28  ;;  %p270_p6 = scmp.lt.u32.totalorder %s266_s28, %s341_s3 }
 0x1c4   :  { %p272_p7 = pnand %p270_p6, %p267_p5 }
 0x1c6   :  { %275 = shalt.err (!%p272_p7)
}
 0x1c7   :  { %s279_s6 = smov 128   ;;  %s280_s7 = smov 8  }
 0x1c8   :  { %209 = dma.vmem_to_hbm [thread:$0]  %s204_s26, 256, %s341_s3, [#allocation4], %s279_s6, %s279_s6, %s280_s7  }
 0x1c9   :  { %276 = dma.done.wait [#allocation4], 256  }
 0x1ca   :  { %277 = vsyncadd [#allocation4], 4294967040 }
 0x1cb   :  { %213 = vsyncpa [#allocation4], 1 }

</bundles_post_ra>
